<compile_context>
chip_gen: v5e
topology: v5e:2x2
jax: 0.10.0
libtpu: 0.0.40
codegen_flags: <defaults>
</compile_context>

<pallas_src>
import jax
import jax.numpy as jnp
from jax.experimental import pallas as pl
from jax.experimental.pallas import tpu as pltpu


# --------------------------------------------------------------------------
# Kernels
# --------------------------------------------------------------------------
def _linear_qnet_kernel_single(x_ref, w_ref, b_ref, o_ref):
    # Whole reduction in one shot: o = x @ W + b.
    # x_ref: (tb, F) input dtype, w_ref: (F, A_pad) bf16, b_ref: (1, A_pad) f32,
    # o_ref: (tb, A_pad) f32.
    o_ref[...] = (
        jnp.dot(
            x_ref[...].astype(jnp.bfloat16),
            w_ref[...],
            preferred_element_type=jnp.float32,
        )
        + b_ref[...]
    )


def _linear_qnet_kernel_tiled(x_ref, w_ref, b_ref, o_ref):
    # K-tiled: accumulate directly into the resident f32 output block.
    # o_ref's index_map ignores k, so it stays in VMEM across the K loop.
    k = pl.program_id(1)

    @pl.when(k == 0)
    def _():
        o_ref[...] = jnp.broadcast_to(b_ref[...], o_ref.shape)

    o_ref[...] += jnp.dot(
        x_ref[...].astype(jnp.bfloat16),
        w_ref[...],
        preferred_element_type=jnp.float32,
    )


# --------------------------------------------------------------------------
# Parameter packing (do ONCE, cache like a parameter)
# --------------------------------------------------------------------------
def _round_up(v, m):
    return ((v + m - 1) // m) * m


def pack_linear_qnet_params(weight, bias, *, tk_max=2048):
    """Pad/cast Linear params once so the forward path never re-packs them.

    Args:
      weight: (F, A) float — transposed vs. torch's (A, F) nn.Linear layout.
      bias:   (A,)  float
      tk_max: reduction tile ceiling; F <= tk_max uses the single-pass kernel.

    Returns dict with padded bf16 weight, f32 bias and tiling metadata.
    """
    f_dim, a_dim = weight.shape
    a_pad = _round_up(max(a_dim, 128), 128)          # lane-dense output slab
    if f_dim <= tk_max:
        tk = f_dim                                   # single-K path
        f_pad = f_dim
    else:
        tk = tk_max                                  # multiple of 128
        f_pad = _round_up(f_dim, tk)

    w_p = jnp.zeros((f_pad, a_pad), jnp.bfloat16).at[:f_dim, :a_dim].set(
        weight.astype(jnp.bfloat16))
    b_p = jnp.zeros((1, a_pad), jnp.float32).at[0, :a_dim].set(
        bias.astype(jnp.float32))
    return {
        "w": w_p, "b": b_p,
        "f_dim": f_dim, "a_dim": a_dim,
        "f_pad": f_pad, "a_pad": a_pad, "tk": tk,
    }


def _vmem_limit_bytes(bytes_needed):
    try:
        cap = int(pltpu.get_tpu_info().vmem_capacity_bytes)
    except Exception:                                # pragma: no cover
        cap = 64 << 20                               # conservative (v7x-sized)
    hi = int(cap * 0.7)                              # leave compiler headroom
    return int(min(max(2 * bytes_needed, 16 << 20), hi))


# --------------------------------------------------------------------------
# Forward
# --------------------------------------------------------------------------
def linear_qnet_forward(state, packed, *, tb_max=256):
    """Q-values for all actions.

    Args:
      state:  (batch, H, W, C*state_history) float
      packed: output of pack_linear_qnet_params
      tb_max: batch tile ceiling for large replay-buffer batches.

    Returns:
      (batch, num_actions) float32
    """
    batch = state.shape[0]
    x = state.reshape(batch, -1)                     # plain-JAX glue reshape
    f_dim, a_dim = packed["f_dim"], packed["a_dim"]
    f_pad, a_pad, tk = packed["f_pad"], packed["a_pad"], packed["tk"]
    assert x.shape[1] == f_dim, "state features do not match packed weight"

    # ---- batch tiling -----------------------------------------------------
    if batch <= tb_max:
        # Block sublane dim == full array dim is always legal (even when not
        # a multiple of 8), so no batch padding is needed for small batches.
        tb, b_pad = batch, batch
    else:
        tb = tb_max                                  # multiple of 8
        b_pad = _round_up(batch, tb)

    # ---- x padding only when the tiling actually requires it --------------
    if b_pad != batch or f_pad != f_dim:
        x_in = jnp.zeros((b_pad, f_pad), x.dtype).at[:batch, :f_dim].set(x)
    else:
        x_in = x                                     # no extra pad/copy launch

    b_tiles = b_pad // tb
    k_tiles = f_pad // tk
    x_bytes = jnp.dtype(x_in.dtype).itemsize

    bytes_needed = (
        2 * tb * tk * x_bytes        # x blocks, double-buffered
        + 2 * tk * a_pad * 2         # W blocks, bf16
        + 2 * a_pad * 4              # bias
        + 2 * tb * a_pad * 4         # output block (f32)
    )
    vmem_limit = _vmem_limit_bytes(bytes_needed)

    cost = pl.CostEstimate(
        flops=2 * b_pad * f_pad * a_pad,
        transcendentals=0,
        bytes_accessed=(b_pad * f_pad * x_bytes + f_pad * a_pad * 2
                        + a_pad * 4 + b_pad * a_pad * 4),
    )

    if k_tiles == 1:
        # Single-pass kernel: no accumulator, no K-loop overhead.
        # TODO(synk): on v7x with b_tiles == 1 the second TensorCore idles;
        # a per-core K split would recover it for tiny batches.
        out = pl.pallas_call(
            _linear_qnet_kernel_single,
            out_shape=jax.ShapeDtypeStruct((b_pad, a_pad), jnp.float32),
            grid_spec=pltpu.PrefetchScalarGridSpec(
                num_scalar_prefetch=0,
                grid=(b_tiles,),
                in_specs=[
                    pl.BlockSpec((tb, f_pad), lambda i: (i, 0)),     # x
                    pl.BlockSpec((f_pad, a_pad), lambda i: (0, 0)),  # W
                    pl.BlockSpec((1, a_pad), lambda i: (0, 0)),      # bias
                ],
                out_specs=pl.BlockSpec((tb, a_pad), lambda i: (i, 0)),
            ),
            compiler_params=pltpu.CompilerParams(
                dimension_semantics=("parallel",),
                vmem_limit_bytes=vmem_limit,
            ),
            cost_estimate=cost,
        )(x_in, packed["w"], packed["b"])
    else:
        # K-tiled kernel: accumulate into the resident f32 output block.
        out = pl.pallas_call(
            _linear_qnet_kernel_tiled,
            out_shape=jax.ShapeDtypeStruct((b_pad, a_pad), jnp.float32),
            grid_spec=pltpu.PrefetchScalarGridSpec(
                num_scalar_prefetch=0,
                grid=(b_tiles, k_tiles),
                in_specs=[
                    pl.BlockSpec((tb, tk), lambda i, k: (i, k)),       # x
                    pl.BlockSpec((tk, a_pad), lambda i, k: (k, 0)),    # W
                    pl.BlockSpec((1, a_pad), lambda i, k: (0, 0)),     # bias
                ],
                out_specs=pl.BlockSpec((tb, a_pad), lambda i, k: (i, 0)),
            ),
            compiler_params=pltpu.CompilerParams(
                dimension_semantics=("parallel", "arbitrary"),
                vmem_limit_bytes=vmem_limit,
            ),
            cost_estimate=cost,
        )(x_in, packed["w"], packed["b"])

    return out[:batch, :a_dim]


# --------------------------------------------------------------------------
# Example / self-check
# --------------------------------------------------------------------------
if __name__ == "__main__":
    # state: (batch, H, W, C * state_history), consistent with the module.
    batch, H, W, C, state_history = 2, 16, 16, 1, 4
    num_actions = 6
    in_features = H * W * C * state_history  # 1024

    key = jax.random.PRNGKey(0)
    k_state, k_w, k_b = jax.random.split(key, 3)

    state = jax.random.normal(
        k_state, (batch, H, W, C * state_history), dtype=jnp.float32
    )
    # Deterministic synthetic parameters matching nn.Linear(in_features, A),
    # stored transposed as (F, A).
    bound = 1.0 / jnp.sqrt(jnp.float32(in_features))
    weight = jax.random.uniform(
        k_w, (in_features, num_actions), minval=-bound, maxval=bound,
        dtype=jnp.float32,
    )
    bias = jax.random.uniform(
        k_b, (num_actions,), minval=-bound, maxval=bound, dtype=jnp.float32
    )

    # Pack once (parameter-like cache), reuse every forward call.
    packed = pack_linear_qnet_params(weight, bias)
    packed = jax.tree_util.tree_map(
        lambda v: jax.block_until_ready(v) if isinstance(v, jax.Array) else v,
        packed,
    )

    q_values = linear_qnet_forward(state, packed)
    q_values = jax.block_until_ready(q_values)
    assert q_values.shape == (batch, num_actions)

    # Reference check: bf16-rounded-input reference (near-exact) and a looser
    # check vs. the full-f32 reference.
    x_flat = state.reshape(batch, -1)
    ref_bf16 = (x_flat.astype(jnp.bfloat16).astype(jnp.float32)
                @ weight.astype(jnp.bfloat16).astype(jnp.float32)) + bias
    ref_f32 = x_flat @ weight + bias
    assert jnp.allclose(q_values, ref_bf16, atol=1e-3, rtol=1e-3)
    assert jnp.allclose(q_values, ref_f32, atol=2e-2, rtol=2e-2)

    print("KERNEL_OK")
</pallas_src>

<mosaic_0001>
module attributes {stable_mosaic.version = 11 : i64} {
  func.func @_linear_qnet_kernel_single(%arg0: i32, %arg1: memref<2x1024xf32, #tpu.memory_space<vmem>>, %arg2: memref<1024x128xbf16, #tpu.memory_space<vmem>>, %arg3: memref<1x128xf32, #tpu.memory_space<vmem>>, %arg4: memref<2x128xf32, #tpu.memory_space<vmem>>) attributes {dimension_semantics = [#tpu.dimension_semantics<parallel>], iteration_bounds = array<i64: 1>, scalar_prefetch = 0 : i64, scratch_operands = 0 : i64, tpu.core_type = #tpu.core_type<tc>, window_params = [{transform_indices = @transform_0, window_bounds = array<i64: 2, 1024>}, {pipeline_mode = #tpu.pipeline_mode<synchronous>, transform_indices = @transform_1, window_bounds = array<i64: 1024, 128>}, {pipeline_mode = #tpu.pipeline_mode<synchronous>, transform_indices = @transform_2, window_bounds = array<i64: 1, 128>}, {transform_indices = @transform_3, window_bounds = array<i64: 2, 128>}]} {
    %c0 = arith.constant 0 : index
    %c0_0 = arith.constant 0 : index
    %0 = vector.load %arg1[%c0, %c0_0] : memref<2x1024xf32, #tpu.memory_space<vmem>>, vector<2x1024xf32>
    %1 = arith.truncf %0 : vector<2x1024xf32> to vector<2x1024xbf16>
    %c0_1 = arith.constant 0 : index
    %c0_2 = arith.constant 0 : index
    %2 = vector.load %arg2[%c0_1, %c0_2] : memref<1024x128xbf16, #tpu.memory_space<vmem>>, vector<1024x128xbf16>
    %cst = arith.constant dense<0.000000e+00> : vector<2x128xf32>
    %3 = tpu.matmul %1, %2, %cst {dimension_numbers = #tpu.dot_dimension_numbers<[1], [0], [0], [1], [0, 0, 1, 1], [], []>} : vector<2x1024xbf16>, vector<1024x128xbf16>, vector<2x128xf32> -> vector<2x128xf32>
    %c0_3 = arith.constant 0 : index
    %c0_4 = arith.constant 0 : index
    %4 = vector.load %arg3[%c0_3, %c0_4] : memref<1x128xf32, #tpu.memory_space<vmem>>, vector<1x128xf32>
    %5 = vector.broadcast %4 : vector<1x128xf32> to vector<2x128xf32>
    %6 = arith.addf %3, %5 : vector<2x128xf32>
    %c0_5 = arith.constant 0 : index
    %c0_6 = arith.constant 0 : index
    %7 = vector.load %arg4[%c0_5, %c0_6] : memref<2x128xf32, #tpu.memory_space<vmem>>, vector<2x128xf32>
    tpu.vector_store %arg4[%c0_5, %c0_6], %6 {strides = array<i32>} : memref<2x128xf32, #tpu.memory_space<vmem>>, vector<2x128xf32>,
    return
  }
  func.func @transform_0(%arg0: i32) -> (i32, i32) {
    %c0_i32 = arith.constant 0 : i32
    %c0_i32_0 = arith.constant 0 : i32
    return %arg0, %c0_i32 : i32, i32
  }
  func.func @transform_1(%arg0: i32) -> (i32, i32) {
    %c0_i32 = arith.constant 0 : i32
    %c0_i32_0 = arith.constant 0 : i32
    %c0_i32_1 = arith.constant 0 : i32
    return %c0_i32, %c0_i32_0 : i32, i32
  }
  func.func @transform_2(%arg0: i32) -> (i32, i32) {
    %c0_i32 = arith.constant 0 : i32
    %c0_i32_0 = arith.constant 0 : i32
    %c0_i32_1 = arith.constant 0 : i32
    return %c0_i32, %c0_i32_0 : i32, i32
  }
  func.func @transform_3(%arg0: i32) -> (i32, i32) {
    %c0_i32 = arith.constant 0 : i32
    %c0_i32_0 = arith.constant 0 : i32
    return %arg0, %c0_i32 : i32, i32
  }
}

</mosaic_0001>

<bundles_post_ra>
// kernel: tpu_custom_call.1
= control target key start
LH: loop header
LB: loop body
LE: loop exit
PB: predicated region body
PF: predicated region fallthrough
CT: control target
= control target key end

     0   :  { %8 = vsyncpa [#allocation3], 0  ;;  %s1156_s0 = inlined_call_operand.hbm [shape: f32[2,1024], index: 0, kind: input, shape index: {}]   ;;  %s1157_s1 = inlined_call_operand.hbm [shape: bf16[1024,128], index: 1, kind: input, shape index: {}]   ;;  %s1158_s2 = inlined_call_operand.vmem [shape: f32[1,128], index: 2, kind: input, shape index: {}]   ;;  %s1159_s3 = inlined_call_operand.hbm [shape: f32[2,128], index: 3, kind: output, shape index: {}]  }
   0x1   :  { %9 = vsyncpa [#allocation6], 0 }
   0x2   :  { %10 = vsyncpa [#allocation4], 0  ;;  %s16_s14 = sshll.u32 %s1156_s0, 4  ;;  %s1119_s15 = smov [#allocation2]   ;;  %s17_s14 = int_to_ptr.hbm [resolvable:$true] %s16_s14 }
   0x3   :  { %s18_s16 = sshll.u32 %s1119_s15, 4  ;;  %s26_s19 = sshll.u32 %s1157_s1, 4  ;;  %s19_s16 = int_to_ptr.vmem [resolvable:$true] %s18_s16  ;;  %s27_s19 = int_to_ptr.hbm [resolvable:$true] %s26_s19 }
   0x4   :  { %21 = dma.hbm_to_vmem [thread:$0]  %s17_s14, 256, %s19_s16, [#allocation3]  }
   0x5   :  { %s1120_s20 = smov [#allocation5]   ;;  %s1121_s22 = smov 64  }
   0x6   :  { %s28_s21 = sshll.u32 %s1120_s20, 4  ;;  %s1122_s23 = smov 4   ;;  %s29_s21 = int_to_ptr.vmem [resolvable:$true] %s28_s21 }
   0x7   :  { %34 = dma.hbm_to_vmem [thread:$0]  %s27_s19, 8192, %s29_s21, [#allocation6], %s1121_s22, %s1121_s22, %s1122_s23  }
   0x8   :  { %1113 = dma.done.wait [#allocation3], 256  }
   0x9   :  { %1114 = vsyncadd [#allocation3], 4294967040 }
   0xa   :  { %1115 = dma.done.wait [#allocation6], 8192  }
   0xb   :  { %1116 = vsyncadd [#allocation6], 4294959104  ;;  %v978_v0 = vld [vmem:[#allocation5 + $0x38] sm:$0xff]  ;;  %v977_v4 = vld [vmem:[#allocation5 + $0x30] sm:$0xff]  ;;  %s1123_s24 = smov [#allocation7]   ;;  %s704_s28 = sshll.u32 %s1159_s3, 4  ;;  %s705_s28 = int_to_ptr.hbm [resolvable:$true] %s704_s28 }
   0xc   :  { %v986_v1 = vld [vmem:[#allocation5 + $0x78] sm:$0xff]  ;;  %592 = vmatpush.bf16.msra.mxu0 %v978_v0  ;;  %v985_v5 = vld [vmem:[#allocation5 + $0x70] sm:$0xff]  ;;  %v976_v8 = vld [vmem:[#allocation5 + $0x28] sm:$0xff]  ;;  %s702_s25 = sshll.u32 %s1123_s24, 4  ;;  %s703_s25 = int_to_ptr.vmem [resolvable:$true] %s702_s25 }
   0xd   :  { %v994_v2 = vld [vmem:[#allocation5 + $0xb8] sm:$0xff]  ;;  %605 = vmatpush.bf16.msra.mxu1 %v986_v1  ;;  %v993_v6 = vld [vmem:[#allocation5 + $0xb0] sm:$0xff]  ;;  %v984_v9 = vld [vmem:[#allocation5 + $0x68] sm:$0xff] }
   0xe   :  { %v1002_v3 = vld [vmem:[#allocation5 + $0xf8] sm:$0xff]  ;;  %618 = vmatpush.bf16.msra.mxu2 %v994_v2  ;;  %v1001_v7 = vld [vmem:[#allocation5 + $0xf0] sm:$0xff]  ;;  %v992_v10 = vld [vmem:[#allocation5 + $0xa8] sm:$0xff] }
   0xf   :  { %631 = vmatpush.bf16.msra.mxu3 %v1002_v3  ;;  %v1000_v11 = vld [vmem:[#allocation5 + $0xe8] sm:$0xff]  ;;  %v975_v12 = vld [vmem:[#allocation5 + $0x20] sm:$0xff]  ;;  %v45_v16 = vld [vmem:[#allocation2] sm:$0xff] }
  0x10   :  { %593 = vmatpush.bf16.msra.mxu0 %v977_v4  ;;  %v983_v13 = vld [vmem:[#allocation5 + $0x60] sm:$0xff]  ;;  %v974_v17 = vld [vmem:[#allocation5 + $0x18] sm:$0xff]  ;;  %49 = vst [vmem:[#allocation1] ss:$4 sm:$0xff] %v45_v16  ;;  %v973_v21 = vld [vmem:[#allocation5 + $0x10] sm:$0xff] }
  0x11   :  { %606 = vmatpush.bf16.msra.mxu1 %v985_v5  ;;  %v991_v14 = vld [vmem:[#allocation5 + $0xa0] sm:$0xff]  ;;  %v982_v18 = vld [vmem:[#allocation5 + $0x58] sm:$0xff]  ;;  %v981_v22 = vld [vmem:[#allocation5 + $0x50] sm:$0xff] }
  0x12   :  { %619 = vmatpush.bf16.msra.mxu2 %v993_v6  ;;  %v999_v15 = vld [vmem:[#allocation5 + $0xe0] sm:$0xff]  ;;  %v990_v19 = vld [vmem:[#allocation5 + $0x98] sm:$0xff]  ;;  %v989_v23 = vld [vmem:[#allocation5 + $0x90] sm:$0xff] }
  0x13   :  { %632 = vmatpush.bf16.msra.mxu3 %v1001_v7  ;;  %v998_v20 = vld [vmem:[#allocation5 + $0xd8] sm:$0xff]  ;;  %v997_v24 = vld [vmem:[#allocation5 + $0xd0] sm:$0xff]  ;;  %v972_v25 = vld [vmem:[#allocation5 + $0x8] sm:$0xff] }
  0x14   :  { %594 = vmatpush.bf16.msra.mxu0 %v976_v8  ;;  %v980_v26 = vld [vmem:[#allocation5 + $0x48] sm:$0xff]  ;;  %v46_v29 = vld [vmem:[#allocation2 + $0x8] sm:$0xff]  ;;  %v971_v30 = vld [vmem:[#allocation5] sm:$0xff] }
  0x15   :  { %607 = vmatpush.bf16.msra.mxu1 %v984_v9  ;;  %v988_v27 = vld [vmem:[#allocation5 + $0x88] sm:$0xff]  ;;  %v979_v31 = vld [vmem:[#allocation5 + $0x40] sm:$0xff]  ;;  %51 = vst [vmem:[#allocation1 + $0x20] ss:$4 sm:$0xff] %v46_v29  ;;  %v1010_v34 = vld [vmem:[#allocation5 + $0x138] sm:$0xff] }
  0x16   :  { %620 = vmatpush.bf16.msra.mxu2 %v992_v10  ;;  %v996_v28 = vld [vmem:[#allocation5 + $0xc8] sm:$0xff]  ;;  %v987_v32 = vld [vmem:[#allocation5 + $0x80] sm:$0xff]  ;;  %v1018_v35 = vld [vmem:[#allocation5 + $0x178] sm:$0xff] }
  0x17   :  { %633 = vmatpush.bf16.msra.mxu3 %v1000_v11  ;;  %v995_v33 = vld [vmem:[#allocation5 + $0xc0] sm:$0xff]  ;;  %v54_v36 = vld.sshfl [vmem:[#allocation1 + $0x10] sm:$0xff pattern:$0x73625140]  ;;  %v1009_v46 = vld [vmem:[#allocation5 + $0x130] sm:$0xff] }
  0x18   :  { %595 = vmatpush.bf16.msra.mxu0 %v975_v12  ;;  %v55_v37 = vld.sshfl [vmem:[#allocation1 + $0x18] sm:$0xff pattern:$0x73625140]  ;;  %v52_v38 = vld.sshfl [vmem:[#allocation1] sm:$0xff pattern:$0x73625140]  ;;  %v70_v42 = vpack.c.bf16 %v54_v36, %v54_v36 }
  0x19   :  { %608 = vmatpush.bf16.msra.mxu1 %v983_v13  ;;  %v53_v39 = vld.sshfl [vmem:[#allocation1 + $0x8] sm:$0xff pattern:$0x73625140]  ;;  %v1026_v40 = vld [vmem:[#allocation5 + $0x1b8] sm:$0xff]  ;;  %v71_v43 = vpack.c.bf16 %v55_v37, %v55_v37  ;;  %v68_v44 = vpack.c.bf16 %v52_v38, %v52_v38  ;;  %v1008_v50 = vld [vmem:[#allocation5 + $0x128] sm:$0xff] }
  0x1a   :  { %621 = vmatpush.bf16.msra.mxu2 %v991_v14  ;;  %v1034_v41 = vld [vmem:[#allocation5 + $0x1f8] sm:$0xff]  ;;  %v69_v45 = vpack.c.bf16 %v53_v39, %v53_v39  ;;  %v1017_v47 = vld [vmem:[#allocation5 + $0x170] sm:$0xff]  ;;  %v1016_v51 = vld [vmem:[#allocation5 + $0x168] sm:$0xff] }
  0x1b   :  { %634 = vmatpush.bf16.msra.mxu3 %v999_v15  ;;  %v1025_v48 = vld [vmem:[#allocation5 + $0x1b0] sm:$0xff]  ;;  %v1024_v52 = vld [vmem:[#allocation5 + $0x1a8] sm:$0xff]  ;;  %v1007_v54 = vld [vmem:[#allocation5 + $0x120] sm:$0xff] }
  0x1c   :  { %596 = vmatpush.bf16.msra.mxu0 %v974_v17  ;;  %v1033_v49 = vld [vmem:[#allocation5 + $0x1f0] sm:$0xff]  ;;  %v1032_v53 = vld [vmem:[#allocation5 + $0x1e8] sm:$0xff]  ;;  %v1015_v55 = vld [vmem:[#allocation5 + $0x160] sm:$0xff] }
  0x1d   :  { %609 = vmatpush.bf16.msra.mxu1 %v982_v18  ;;  %v1023_v56 = vld [vmem:[#allocation5 + $0x1a0] sm:$0xff]  ;;  %v1006_v58 = vld [vmem:[#allocation5 + $0x118] sm:$0xff]  ;;  %v1005_v62 = vld [vmem:[#allocation5 + $0x110] sm:$0xff] }
  0x1e   :  { %622 = vmatpush.bf16.msra.mxu2 %v990_v19  ;;  %v1031_v57 = vld [vmem:[#allocation5 + $0x1e0] sm:$0xff]  ;;  %v1014_v59 = vld [vmem:[#allocation5 + $0x158] sm:$0xff]  ;;  %v1013_v63 = vld [vmem:[#allocation5 + $0x150] sm:$0xff] }
  0x1f   :  { %635 = vmatpush.bf16.msra.mxu3 %v998_v20  ;;  %v1022_v60 = vld [vmem:[#allocation5 + $0x198] sm:$0xff]  ;;  %v1021_v0 = vld [vmem:[#allocation5 + $0x190] sm:$0xff]  ;;  %v1004_v2 = vld [vmem:[#allocation5 + $0x108] sm:$0xff] }
  0x20   :  { %597 = vmatpush.bf16.msra.mxu0 %v973_v21  ;;  %v1030_v61 = vld [vmem:[#allocation5 + $0x1d8] sm:$0xff]  ;;  %v1029_v1 = vld [vmem:[#allocation5 + $0x1d0] sm:$0xff]  ;;  %v1012_v3 = vld [vmem:[#allocation5 + $0x148] sm:$0xff] }
  0x21   :  { %610 = vmatpush.bf16.msra.mxu1 %v981_v22  ;;  %v1020_v4 = vld [vmem:[#allocation5 + $0x188] sm:$0xff]  ;;  %v1003_v6 = vld [vmem:[#allocation5 + $0x100] sm:$0xff]  ;;  %v57_v11 = vld.sshfl [vmem:[#allocation1 + $0x28] sm:$0xff pattern:$0x73625140] }
  0x22   :  { %623 = vmatpush.bf16.msra.mxu2 %v989_v23  ;;  %v1028_v5 = vld [vmem:[#allocation5 + $0x1c8] sm:$0xff]  ;;  %v1011_v7 = vld [vmem:[#allocation5 + $0x140] sm:$0xff]  ;;  %v58_v12 = vld.sshfl [vmem:[#allocation1 + $0x30] sm:$0xff pattern:$0x73625140]  ;;  %v73_v15 = vpack.c.bf16 %v57_v11, %v57_v11 }
  0x23   :  { %636 = vmatpush.bf16.msra.mxu3 %v997_v24  ;;  %v1019_v8 = vld [vmem:[#allocation5 + $0x180] sm:$0xff]  ;;  %v56_v10 = vld.sshfl [vmem:[#allocation1 + $0x20] sm:$0xff pattern:$0x73625140]  ;;  %v74_v16 = vpack.c.bf16 %v58_v12, %v58_v12 }
  0x24   :  { %598 = vmatpush.bf16.msra.mxu0 %v972_v25  ;;  %v1027_v9 = vld [vmem:[#allocation5 + $0x1c0] sm:$0xff]  ;;  %v72_v14 = vpack.c.bf16 %v56_v10, %v56_v10  ;;  %v1040_v24 = vld [vmem:[%s1158_s2] ss:$0 sm:$0xff] }
  0x25   :  { %611 = vmatpush.bf16.msra.mxu1 %v980_v26  ;;  %v59_v13 = vld.sshfl [vmem:[#allocation1 + $0x38] sm:$0xff pattern:$0x73625140] }
  0x26   :  { %624 = vmatpush.bf16.msra.mxu2 %v988_v27  ;;  %v75_v17 = vpack.c.bf16 %v59_v13, %v59_v13 }
  0x27   :  { %637 = vmatpush.bf16.msra.mxu3 %v996_v28 }
  0x28   :  { %599 = vmatpush.bf16.msra.mxu0 %v971_v30 }
  0x29   :  { %612 = vmatpush.bf16.msra.mxu1 %v979_v31 }
  0x2a   :  { %625 = vmatpush.bf16.msra.mxu2 %v987_v32 }
  0x2b   :  { %638 = vmatpush.bf16.msra.mxu3 %v995_v33  ;;  %600 = vmatmul.bf16.vlgmr.msra.gmra.mxu0 %v68_v44 }
  0x2c   :  { %644 = vmatpush.bf16.msrb.mxu0 %v1010_v34  ;;  %613 = vmatmul.bf16.vlgmr.msra.gmra.mxu1 %v69_v45 }
  0x2d   :  { %657 = vmatpush.bf16.msrb.mxu1 %v1018_v35  ;;  %626 = vmatmul.bf16.vlgmr.msra.gmra.mxu2 %v70_v42 }
  0x2e   :  { %670 = vmatpush.bf16.msrb.mxu2 %v1026_v40  ;;  %639 = vmatmul.bf16.vlgmr.msra.gmra.mxu3 %v71_v43 }
  0x2f   :  { %683 = vmatpush.bf16.msrb.mxu3 %v1034_v41 }
  0x30   :  { %645 = vmatpush.bf16.msrb.mxu0 %v1009_v46 }
  0x31   :  { %658 = vmatpush.bf16.msrb.mxu1 %v1017_v47 }
  0x32   :  { %671 = vmatpush.bf16.msrb.mxu2 %v1025_v48 }
  0x33   :  { %684 = vmatpush.bf16.msrb.mxu3 %v1033_v49 }
  0x34   :  { %646 = vmatpush.bf16.msrb.mxu0 %v1008_v50 }
  0x35   :  { %659 = vmatpush.bf16.msrb.mxu1 %v1016_v51 }
  0x36   :  { %672 = vmatpush.bf16.msrb.mxu2 %v1024_v52 }
  0x37   :  { %685 = vmatpush.bf16.msrb.mxu3 %v1032_v53 }
  0x38   :  { %647 = vmatpush.bf16.msrb.mxu0 %v1007_v54 }
  0x39   :  { %660 = vmatpush.bf16.msrb.mxu1 %v1015_v55 }
  0x3a   :  { %673 = vmatpush.bf16.msrb.mxu2 %v1023_v56 }
  0x3b   :  { %686 = vmatpush.bf16.msrb.mxu3 %v1031_v57 }
  0x3c   :  { %648 = vmatpush.bf16.msrb.mxu0 %v1006_v58 }
  0x3d   :  { %661 = vmatpush.bf16.msrb.mxu1 %v1014_v59 }
  0x3e   :  { %674 = vmatpush.bf16.msrb.mxu2 %v1022_v60 }
  0x3f   :  { %687 = vmatpush.bf16.msrb.mxu3 %v1030_v61 }
  0x40   :  { %649 = vmatpush.bf16.msrb.mxu0 %v1005_v62 }
  0x41   :  { %662 = vmatpush.bf16.msrb.mxu1 %v1013_v63 }
  0x42   :  { %675 = vmatpush.bf16.msrb.mxu2 %v1021_v0 }
  0x43   :  { %688 = vmatpush.bf16.msrb.mxu3 %v1029_v1 }
  0x44   :  { %650 = vmatpush.bf16.msrb.mxu0 %v1004_v2 }
  0x45   :  { %663 = vmatpush.bf16.msrb.mxu1 %v1012_v3 }
  0x46   :  { %676 = vmatpush.bf16.msrb.mxu2 %v1020_v4 }
  0x47   :  { %689 = vmatpush.bf16.msrb.mxu3 %v1028_v5 }
  0x48   :  { %651 = vmatpush.bf16.msrb.mxu0 %v1003_v6 }
  0x49   :  { %664 = vmatpush.bf16.msrb.mxu1 %v1011_v7 }
  0x4a   :  { %677 = vmatpush.bf16.msrb.mxu2 %v1019_v8 }
  0x4b   :  { %690 = vmatpush.bf16.msrb.mxu3 %v1027_v9  ;;  %652 = vmatmul.bf16.vlgmr.msrb.gmra.mxu0 %v72_v14 }
  0x4c   :  { %665 = vmatmul.bf16.vlgmr.msrb.gmra.mxu1 %v73_v15 }
  0x4d   :  { %678 = vmatmul.bf16.vlgmr.msrb.gmra.mxu2 %v74_v16 }
  0x4e   :  { %691 = vmatmul.bf16.vlgmr.msrb.gmra.mxu3 %v75_v17 }
  0xa8   :  { %v601_v18 = vpop.f32.mrf.mxu0 }
  0xa9   :  { %v614_v19 = vpop.f32.mrf.mxu1  ;;  %v602_v27 = vadd.f32 %v1040_v24, %v601_v18 }
  0xab   :  { %v615_v28 = vadd.f32 %v614_v19, %v602_v27 }
  0xb0   :  { %v627_v20 = vpop.f32.mrf.mxu2  ;;  %v603_v22 = vpop.f32.mrf.mxu0 }
  0xb1   :  { %v640_v21 = vpop.f32.mrf.mxu3  ;;  %v616_v23 = vpop.f32.mrf.mxu1  ;;  %v628_v29 = vadd.f32 %v627_v20, %v615_v28 }
  0xb3   :  { %v641_v30 = vadd.f32 %v640_v21, %v628_v29 }
  0xb8   :  { %v629_v25 = vpop.f32.mrf.mxu2 }
  0xb9   :  { %v642_v26 = vpop.f32.mrf.mxu3 }
  0xc8   :  { %v653_v31 = vpop.f32.mrf.mxu0 }
  0xc9   :  { %v666_v32 = vpop.f32.mrf.mxu1  ;;  %v654_v33 = vadd.f32 %v653_v31, %v641_v30 }
  0xcb   :  { %v667_v34 = vadd.f32 %v666_v32, %v654_v33 }
  0xd0   :  { %v679_v35 = vpop.f32.mrf.mxu2  ;;  %v655_v38 = vpop.f32.mrf.mxu0 }
  0xd1   :  { %v692_v36 = vpop.f32.mrf.mxu3  ;;  %v680_v37 = vadd.f32 %v679_v35, %v667_v34  ;;  %v668_v39 = vpop.f32.mrf.mxu1 }
  0xd3   :  { %v693_v40 = vadd.f32 %v692_v36, %v680_v37 }
  0xd5   :  { %696 = vst [vmem:[#allocation7] sm:$0x3] %v693_v40 }
  0xd6   :  { %707 = dma.vmem_to_hbm [thread:$0]  %s703_s25, 32, %s705_s28, [#allocation4]  }
  0xd8   :  { %v681_v41 = vpop.f32.mrf.mxu2 }
  0xd9   :  { %v694_v42 = vpop.f32.mrf.mxu3 }
  0xda   :  { %1117 = dma.done.wait [#allocation4], 32  }
  0xdb   :  { %1118 = vsyncadd [#allocation4], 4294967264 }
  0xdc   :  { %712 = vsyncpa [#allocation3], 1 }
  0xdd   :  { %713 = vsyncpa [#allocation6], 1 }
  0xde   :  { %714 = vsyncpa [#allocation4], 1 }

</bundles_post_ra>
